<compile_context>
chip_gen: v7x
topology: tpu7x:2x2x1
jax: 0.10.0
libtpu: 0.0.40
codegen_flags: <defaults>
</compile_context>

<pallas_src>
import functools

import jax
import jax.numpy as jnp
from jax.experimental import pallas as pl
from jax.experimental.pallas import tpu as pltpu

LANE = 128


def _round_up(v, m):
    return (v + m - 1) // m * m


def _device_kind():
    try:
        return jax.devices()[0].device_kind.lower()
    except Exception:
        return ""


_KIND = _device_kind()
# v6e / v7x MXUs are 256 wide; v5e's is 128 wide.
_WIDE_MXU = any(t in _KIND for t in ("v6", "v7", "trillium"))
# bf16 params/activations by default on v5e/v6e/v7x (MXU accumulates in f32 anyway).
_BF16_DEFAULT = any(t in _KIND for t in ("v5e", "v5 lite", "v6", "v7", "trillium"))


def _vmem_budget_bytes():
    """Generation-aware VMEM budget with headroom for Mosaic scratch / semaphores."""
    phys = None
    try:
        info = pltpu.get_tpu_info()
        for name in ("vmem_capacity_bytes", "vmem_size_bytes", "vmem_bytes"):
            v = getattr(info, name, None)
            if v:
                phys = int(v)
                break
    except Exception:
        phys = None
    if phys is None:
        if any(t in _KIND for t in ("v5e", "v5 lite", "v6", "trillium")):
            phys = 128 * 1024 * 1024          # v5e / v6e
        else:
            phys = 64 * 1024 * 1024           # v7x per-TC (conservative default)
    # ~7/8 of physical minus 4 MiB: ~52 MiB on v7x, ~108 MiB on v5e/v6e.
    return max(32 * 1024 * 1024, phys * 7 // 8 - (4 << 20))


_VMEM_BUDGET = _vmem_budget_bytes()


def _probe_single_buffer():
    """Constant-index residents only need one pipeline buffer (halves their VMEM)."""
    try:
        pl.BlockSpec((8, LANE), lambda i: (0, 0), pipeline_mode=pl.Buffered(1))
        return True
    except Exception:
        return False


_SINGLE_BUFFER_OK = _probe_single_buffer()


def _pad_feature(d):
    # On v6e/v7x, pad real dims >=256 to a 256 multiple so each MXU pass is full;
    # smaller dims stay at the 128-lane minimum (no pure zero-FLOP inflation).
    if _WIDE_MXU and d >= 256:
        return _round_up(d, 256)
    return _round_up(d, LANE)


def mlp_kernel(x_ref,
               w1_ref, b1_ref, w2_ref, b2_ref, w3_ref, b3_ref,
               w4_ref, b4_ref, w5_ref, b5_ref, w6_ref, b6_ref,
               out_ref):
    """One batch tile: 5x (matmul + bias + ReLU) + final matmul + bias, fully in VMEM."""
    layers = ((w1_ref, b1_ref), (w2_ref, b2_ref), (w3_ref, b3_ref),
              (w4_ref, b4_ref), (w5_ref, b5_ref), (w6_ref, b6_ref))
    compute_dtype = w1_ref.dtype
    n_layers = len(layers)

    h = x_ref[...]
    for idx, (w_ref, b_ref) in enumerate(layers):
        bias = b_ref[...].astype(jnp.float32)            # hoisted single bias load per layer
        acc = jnp.dot(h, w_ref[...], preferred_element_type=jnp.float32) + bias
        if idx < n_layers - 1:
            acc = jnp.maximum(acc, 0.0)                  # f32 epilogue (VPU-friendly on v5e)
            h = acc.astype(compute_dtype)                # next matmul consumes param dtype
        else:
            h = acc                                      # fc6: no ReLU on the output layer
    out_ref[...] = h.astype(out_ref.dtype)


@functools.partial(jax.jit, static_argnames=("block_batch", "compute_dtype"))
def mlp_forward(x, params, *, block_batch=1024, compute_dtype=None):
    """params: list of (W, b) with W shaped (in, out), b shaped (1, out).
    Returns the (batch, n_out) f32 result of the fused 6-layer MLP."""
    batch, n_in = x.shape
    n_out = params[-1][0].shape[1]

    if compute_dtype is None:
        compute_dtype = jnp.bfloat16 if _BF16_DEFAULT else jnp.float32
    cdtype = jnp.dtype(compute_dtype)

    # ---- lane-pad feature dims (dtype independent) ---------------------------
    in_p = _pad_feature(n_in)
    out_pads = [_pad_feature(w.shape[1]) for w, _ in params]
    out_p_last = out_pads[-1]

    param_elems = 0
    prev_p = in_p
    for op in out_pads:
        param_elems += prev_p * op + op
        prev_p = op
    param_buf = 1 if _SINGLE_BUFFER_OK else 2

    # ---- dtype-aware batch tiling + VMEM planning ----------------------------
    def plan(dt, blk):
        it = jnp.dtype(dt).itemsize
        sub = max(8, 32 // it)                   # f32 -> 8, bf16 -> 16, int8/fp8 -> 32
        batch_s = _round_up(batch, sub)
        tb = min(blk, batch_s)
        if tb == batch_s and batch_s >= 512:
            tb = -(-batch_s // 2)                # >=2 grid steps so megacore shards them
        tb = _round_up(tb, sub)
        if tb >= 256:
            tb = _round_up(tb, 256)              # fill the 256-deep MXU on v6e/v7x
        est = (param_elems * it * param_buf              # resident weights/biases
               + 2 * tb * in_p * it                      # double-buffered input tile
               + 2 * tb * out_p_last * 4                 # double-buffered f32 output tile
               + 3 * tb * max(out_pads) * 4)             # live f32 intermediates
        return sub, tb, est

    sub, tb, est = plan(cdtype, block_batch)
    if est > _VMEM_BUDGET and cdtype.itemsize > 2:
        cdtype = jnp.dtype(jnp.bfloat16)         # halve resident weights + DMA bytes
        sub, tb, est = plan(cdtype, block_batch)
    blk = block_batch
    while est > _VMEM_BUDGET and tb > sub:
        blk = max(sub, tb // 2)                  # shrink the batch tile before giving up
        sub, tb, est = plan(cdtype, blk)
    if est > _VMEM_BUDGET:
        # TODO(synk): add a K-tiled weight-streaming fallback (second grid axis over the
        # hidden dim with an f32 VMEM accumulator) for hidden sizes whose residents
        # exceed VMEM even in bf16 with single-buffered params.
        raise ValueError(
            f"resident-weight MLP needs ~{est} B VMEM > budget {_VMEM_BUDGET} B; "
            "hidden dim too large for the fused resident-weight path")

    batch_p = _round_up(batch, tb)
    grid = (batch_p // tb,)

    # ---- pad inputs only when needed (skip extra HBM passes when aligned) ----
    x_c = x.astype(cdtype)
    if batch_p != batch or in_p != n_in:
        x_c = jnp.pad(x_c, ((0, batch_p - batch), (0, in_p - n_in)))

    flat = []
    prev_p = in_p
    for (w, b), op in zip(params, out_pads):
        w_c = w.astype(cdtype)
        if w.shape != (prev_p, op):
            w_c = jnp.pad(w_c, ((0, prev_p - w.shape[0]), (0, op - w.shape[1])))
        b_c = b.astype(cdtype)
        if b.shape[1] != op:
            b_c = jnp.pad(b_c, ((0, 0), (0, op - b.shape[1])))
        flat.extend([w_c, b_c])
        prev_p = op

    # ---- BlockSpecs: batch-tiled activations/outputs, resident params --------
    def resident_spec(shape):
        if _SINGLE_BUFFER_OK:
            # Constant index_map -> single pipeline buffer is enough.
            return pl.BlockSpec(shape, lambda i: (0, 0), pipeline_mode=pl.Buffered(1))
        return pl.BlockSpec(shape, lambda i: (0, 0))

    x_spec = pl.BlockSpec((tb, in_p), lambda i: (i, 0))
    param_specs = [resident_spec(a.shape) for a in flat]
    out_spec = pl.BlockSpec((tb, out_p_last), lambda i: (i, 0))

    out_padded = pl.pallas_call(
        mlp_kernel,
        out_shape=jax.ShapeDtypeStruct((batch_p, out_p_last), jnp.float32),
        grid_spec=pltpu.PrefetchScalarGridSpec(
            num_scalar_prefetch=0,
            grid=grid,
            in_specs=[x_spec] + param_specs,
            out_specs=out_spec,
        ),
        compiler_params=pltpu.CompilerParams(
            dimension_semantics=("parallel",),     # batch tiles shard across v7x's two TCs
            vmem_limit_bytes=int(_VMEM_BUDGET),
        ),
    )(x_c, *flat)

    if batch_p != batch or out_p_last != n_out:
        out_padded = out_padded[:batch, :n_out]
    return out_padded


def init_params(key, n_in, n_mid, n_out):
    """PyTorch nn.Linear default init: U(-1/sqrt(fan_in), 1/sqrt(fan_in)).
    Weights are stored pre-transposed as (in, out); biases as (1, out)."""
    dims = [(n_in, n_mid), (n_mid, n_mid), (n_mid, n_mid),
            (n_mid, n_mid), (n_mid, n_mid), (n_mid, n_out)]
    params = []
    for (fan_in, fan_out) in dims:
        key, kw, kb = jax.random.split(key, 3)
        bound = 1.0 / jnp.sqrt(fan_in)
        w = jax.random.uniform(kw, (fan_in, fan_out), jnp.float32, -bound, bound)
        b = jax.random.uniform(kb, (1, fan_out), jnp.float32, -bound, bound)
        params.append((w, b))
    return params


def mlp_reference(x, params):
    h = x
    for i, (w, b) in enumerate(params):
        h = h @ w + b
        if i < len(params) - 1:
            h = jnp.maximum(h, 0.0)
    return h


if __name__ == "__main__":
    key = jax.random.PRNGKey(0)
    k_x, k_p = jax.random.split(key)

    batch, n_in, n_mid, n_out = 8, 16, 32, 8
    x = jax.random.normal(k_x, (batch, n_in), dtype=jnp.float32)
    params = init_params(k_p, n_in, n_mid, n_out)
    ref = mlp_reference(x, params)

    # f32 path: exact match against the pure-JAX reference.
    out_f32 = jax.block_until_ready(mlp_forward(x, params, compute_dtype=jnp.float32))
    assert out_f32.shape == (batch, n_out)
    assert jnp.allclose(out_f32, ref, atol=1e-5, rtol=1e-5)

    # bf16 weights/activations with f32 accumulation (v5e/v6e/v7x fast path).
    out_bf16 = jax.block_until_ready(mlp_forward(x, params, compute_dtype=jnp.bfloat16))
    assert out_bf16.shape == (batch, n_out)
    assert jnp.allclose(out_bf16, ref, atol=5e-2, rtol=5e-2)

    # Generation-aware default dtype path.
    out_def = jax.block_until_ready(mlp_forward(x, params))
    assert out_def.shape == (batch, n_out)
    assert jnp.allclose(out_def, ref, atol=5e-2, rtol=5e-2)

    print("KERNEL_OK")
</pallas_src>

<mosaic_0001>
module attributes {stable_mosaic.version = 11 : i64} {
  func.func @mlp_kernel(%arg0: i32, %arg1: memref<8x128xf32, #tpu.memory_space<vmem>>, %arg2: memref<128x128xf32, #tpu.memory_space<vmem>>, %arg3: memref<1x128xf32, #tpu.memory_space<vmem>>, %arg4: memref<128x128xf32, #tpu.memory_space<vmem>>, %arg5: memref<1x128xf32, #tpu.memory_space<vmem>>, %arg6: memref<128x128xf32, #tpu.memory_space<vmem>>, %arg7: memref<1x128xf32, #tpu.memory_space<vmem>>, %arg8: memref<128x128xf32, #tpu.memory_space<vmem>>, %arg9: memref<1x128xf32, #tpu.memory_space<vmem>>, %arg10: memref<128x128xf32, #tpu.memory_space<vmem>>, %arg11: memref<1x128xf32, #tpu.memory_space<vmem>>, %arg12: memref<128x128xf32, #tpu.memory_space<vmem>>, %arg13: memref<1x128xf32, #tpu.memory_space<vmem>>, %arg14: memref<8x128xf32, #tpu.memory_space<vmem>>) attributes {dimension_semantics = [#tpu.dimension_semantics<parallel>], iteration_bounds = array<i64: 1>, scalar_prefetch = 0 : i64, scratch_operands = 0 : i64, tpu.core_type = #tpu.core_type<tc>, window_params = [{transform_indices = @transform_0, window_bounds = array<i64: 8, 128>}, {pipeline_mode = #tpu.pipeline_mode<synchronous>, transform_indices = @transform_1, window_bounds = array<i64: 128, 128>}, {pipeline_mode = #tpu.pipeline_mode<synchronous>, transform_indices = @transform_2, window_bounds = array<i64: 1, 128>}, {pipeline_mode = #tpu.pipeline_mode<synchronous>, transform_indices = @transform_3, window_bounds = array<i64: 128, 128>}, {pipeline_mode = #tpu.pipeline_mode<synchronous>, transform_indices = @transform_4, window_bounds = array<i64: 1, 128>}, {pipeline_mode = #tpu.pipeline_mode<synchronous>, transform_indices = @transform_5, window_bounds = array<i64: 128, 128>}, {pipeline_mode = #tpu.pipeline_mode<synchronous>, transform_indices = @transform_6, window_bounds = array<i64: 1, 128>}, {pipeline_mode = #tpu.pipeline_mode<synchronous>, transform_indices = @transform_7, window_bounds = array<i64: 128, 128>}, {pipeline_mode = #tpu.pipeline_mode<synchronous>, transform_indices = @transform_8, window_bounds = array<i64: 1, 128>}, {pipeline_mode = #tpu.pipeline_mode<synchronous>, transform_indices = @transform_9, window_bounds = array<i64: 128, 128>}, {pipeline_mode = #tpu.pipeline_mode<synchronous>, transform_indices = @transform_10, window_bounds = array<i64: 1, 128>}, {pipeline_mode = #tpu.pipeline_mode<synchronous>, transform_indices = @transform_11, window_bounds = array<i64: 128, 128>}, {pipeline_mode = #tpu.pipeline_mode<synchronous>, transform_indices = @transform_12, window_bounds = array<i64: 1, 128>}, {transform_indices = @transform_13, window_bounds = array<i64: 8, 128>}]} {
    %c0 = arith.constant 0 : index
    %c0_0 = arith.constant 0 : index
    %0 = vector.load %arg1[%c0, %c0_0] : memref<8x128xf32, #tpu.memory_space<vmem>>, vector<8x128xf32>
    %c0_1 = arith.constant 0 : index
    %c0_2 = arith.constant 0 : index
    %1 = vector.load %arg3[%c0_1, %c0_2] : memref<1x128xf32, #tpu.memory_space<vmem>>, vector<1x128xf32>
    %c0_3 = arith.constant 0 : index
    %c0_4 = arith.constant 0 : index
    %2 = vector.load %arg2[%c0_3, %c0_4] : memref<128x128xf32, #tpu.memory_space<vmem>>, vector<128x128xf32>
    %cst = arith.constant dense<0.000000e+00> : vector<8x128xf32>
    %3 = tpu.matmul %0, %2, %cst {dimension_numbers = #tpu.dot_dimension_numbers<[1], [0], [0], [1], [0, 0, 1, 1], [], []>} : vector<8x128xf32>, vector<128x128xf32>, vector<8x128xf32> -> vector<8x128xf32>
    %4 = vector.broadcast %1 : vector<1x128xf32> to vector<8x128xf32>
    %5 = arith.addf %3, %4 : vector<8x128xf32>
    %cst_5 = arith.constant 0.000000e+00 : f32
    %6 = vector.broadcast %cst_5 : f32 to vector<8x128xf32>
    %7 = arith.maximumf %5, %6 : vector<8x128xf32>
    %c0_6 = arith.constant 0 : index
    %c0_7 = arith.constant 0 : index
    %8 = vector.load %arg5[%c0_6, %c0_7] : memref<1x128xf32, #tpu.memory_space<vmem>>, vector<1x128xf32>
    %c0_8 = arith.constant 0 : index
    %c0_9 = arith.constant 0 : index
    %9 = vector.load %arg4[%c0_8, %c0_9] : memref<128x128xf32, #tpu.memory_space<vmem>>, vector<128x128xf32>
    %cst_10 = arith.constant dense<0.000000e+00> : vector<8x128xf32>
    %10 = tpu.matmul %7, %9, %cst_10 {dimension_numbers = #tpu.dot_dimension_numbers<[1], [0], [0], [1], [0, 0, 1, 1], [], []>} : vector<8x128xf32>, vector<128x128xf32>, vector<8x128xf32> -> vector<8x128xf32>
    %11 = vector.broadcast %8 : vector<1x128xf32> to vector<8x128xf32>
    %12 = arith.addf %10, %11 : vector<8x128xf32>
    %cst_11 = arith.constant 0.000000e+00 : f32
    %13 = vector.broadcast %cst_11 : f32 to vector<8x128xf32>
    %14 = arith.maximumf %12, %13 : vector<8x128xf32>
    %c0_12 = arith.constant 0 : index
    %c0_13 = arith.constant 0 : index
    %15 = vector.load %arg7[%c0_12, %c0_13] : memref<1x128xf32, #tpu.memory_space<vmem>>, vector<1x128xf32>
    %c0_14 = arith.constant 0 : index
    %c0_15 = arith.constant 0 : index
    %16 = vector.load %arg6[%c0_14, %c0_15] : memref<128x128xf32, #tpu.memory_space<vmem>>, vector<128x128xf32>
    %cst_16 = arith.constant dense<0.000000e+00> : vector<8x128xf32>
    %17 = tpu.matmul %14, %16, %cst_16 {dimension_numbers = #tpu.dot_dimension_numbers<[1], [0], [0], [1], [0, 0, 1, 1], [], []>} : vector<8x128xf32>, vector<128x128xf32>, vector<8x128xf32> -> vector<8x128xf32>
    %18 = vector.broadcast %15 : vector<1x128xf32> to vector<8x128xf32>
    %19 = arith.addf %17, %18 : vector<8x128xf32>
    %cst_17 = arith.constant 0.000000e+00 : f32
    %20 = vector.broadcast %cst_17 : f32 to vector<8x128xf32>
    %21 = arith.maximumf %19, %20 : vector<8x128xf32>
    %c0_18 = arith.constant 0 : index
    %c0_19 = arith.constant 0 : index
    %22 = vector.load %arg9[%c0_18, %c0_19] : memref<1x128xf32, #tpu.memory_space<vmem>>, vector<1x128xf32>
    %c0_20 = arith.constant 0 : index
    %c0_21 = arith.constant 0 : index
    %23 = vector.load %arg8[%c0_20, %c0_21] : memref<128x128xf32, #tpu.memory_space<vmem>>, vector<128x128xf32>
    %cst_22 = arith.constant dense<0.000000e+00> : vector<8x128xf32>
    %24 = tpu.matmul %21, %23, %cst_22 {dimension_numbers = #tpu.dot_dimension_numbers<[1], [0], [0], [1], [0, 0, 1, 1], [], []>} : vector<8x128xf32>, vector<128x128xf32>, vector<8x128xf32> -> vector<8x128xf32>
    %25 = vector.broadcast %22 : vector<1x128xf32> to vector<8x128xf32>
    %26 = arith.addf %24, %25 : vector<8x128xf32>
    %cst_23 = arith.constant 0.000000e+00 : f32
    %27 = vector.broadcast %cst_23 : f32 to vector<8x128xf32>
    %28 = arith.maximumf %26, %27 : vector<8x128xf32>
    %c0_24 = arith.constant 0 : index
    %c0_25 = arith.constant 0 : index
    %29 = vector.load %arg11[%c0_24, %c0_25] : memref<1x128xf32, #tpu.memory_space<vmem>>, vector<1x128xf32>
    %c0_26 = arith.constant 0 : index
    %c0_27 = arith.constant 0 : index
    %30 = vector.load %arg10[%c0_26, %c0_27] : memref<128x128xf32, #tpu.memory_space<vmem>>, vector<128x128xf32>
    %cst_28 = arith.constant dense<0.000000e+00> : vector<8x128xf32>
    %31 = tpu.matmul %28, %30, %cst_28 {dimension_numbers = #tpu.dot_dimension_numbers<[1], [0], [0], [1], [0, 0, 1, 1], [], []>} : vector<8x128xf32>, vector<128x128xf32>, vector<8x128xf32> -> vector<8x128xf32>
    %32 = vector.broadcast %29 : vector<1x128xf32> to vector<8x128xf32>
    %33 = arith.addf %31, %32 : vector<8x128xf32>
    %cst_29 = arith.constant 0.000000e+00 : f32
    %34 = vector.broadcast %cst_29 : f32 to vector<8x128xf32>
    %35 = arith.maximumf %33, %34 : vector<8x128xf32>
    %c0_30 = arith.constant 0 : index
    %c0_31 = arith.constant 0 : index
    %36 = vector.load %arg13[%c0_30, %c0_31] : memref<1x128xf32, #tpu.memory_space<vmem>>, vector<1x128xf32>
    %c0_32 = arith.constant 0 : index
    %c0_33 = arith.constant 0 : index
    %37 = vector.load %arg12[%c0_32, %c0_33] : memref<128x128xf32, #tpu.memory_space<vmem>>, vector<128x128xf32>
    %cst_34 = arith.constant dense<0.000000e+00> : vector<8x128xf32>
    %38 = tpu.matmul %35, %37, %cst_34 {dimension_numbers = #tpu.dot_dimension_numbers<[1], [0], [0], [1], [0, 0, 1, 1], [], []>} : vector<8x128xf32>, vector<128x128xf32>, vector<8x128xf32> -> vector<8x128xf32>
    %39 = vector.broadcast %36 : vector<1x128xf32> to vector<8x128xf32>
    %40 = arith.addf %38, %39 : vector<8x128xf32>
    %c0_35 = arith.constant 0 : index
    %c0_36 = arith.constant 0 : index
    %41 = vector.load %arg14[%c0_35, %c0_36] : memref<8x128xf32, #tpu.memory_space<vmem>>, vector<8x128xf32>
    tpu.vector_store %arg14[%c0_35, %c0_36], %40 {strides = array<i32>} : memref<8x128xf32, #tpu.memory_space<vmem>>, vector<8x128xf32>,
    return
  }
  func.func @transform_0(%arg0: i32) -> (i32, i32) {
    %c0_i32 = arith.constant 0 : i32
    %c0_i32_0 = arith.constant 0 : i32
    return %arg0, %c0_i32 : i32, i32
  }
  func.func @transform_1(%arg0: i32) -> (i32, i32) {
    %c0_i32 = arith.constant 0 : i32
    %c0_i32_0 = arith.constant 0 : i32
    %c0_i32_1 = arith.constant 0 : i32
    return %c0_i32, %c0_i32_0 : i32, i32
  }
  func.func @transform_2(%arg0: i32) -> (i32, i32) {
    %c0_i32 = arith.constant 0 : i32
    %c0_i32_0 = arith.constant 0 : i32
    %c0_i32_1 = arith.constant 0 : i32
    return %c0_i32, %c0_i32_0 : i32, i32
  }
  func.func @transform_3(%arg0: i32) -> (i32, i32) {
    %c0_i32 = arith.constant 0 : i32
    %c0_i32_0 = arith.constant 0 : i32
    %c0_i32_1 = arith.constant 0 : i32
    return %c0_i32, %c0_i32_0 : i32, i32
  }
  func.func @transform_4(%arg0: i32) -> (i32, i32) {
    %c0_i32 = arith.constant 0 : i32
    %c0_i32_0 = arith.constant 0 : i32
    %c0_i32_1 = arith.constant 0 : i32
    return %c0_i32, %c0_i32_0 : i32, i32
  }
  func.func @transform_5(%arg0: i32) -> (i32, i32) {
    %c0_i32 = arith.constant 0 : i32
    %c0_i32_0 = arith.constant 0 : i32
    %c0_i32_1 = arith.constant 0 : i32
    return %c0_i32, %c0_i32_0 : i32, i32
  }
  func.func @transform_6(%arg0: i32) -> (i32, i32) {
    %c0_i32 = arith.constant 0 : i32
    %c0_i32_0 = arith.constant 0 : i32
    %c0_i32_1 = arith.constant 0 : i32
    return %c0_i32, %c0_i32_0 : i32, i32
  }
  func.func @transform_7(%arg0: i32) -> (i32, i32) {
    %c0_i32 = arith.constant 0 : i32
    %c0_i32_0 = arith.constant 0 : i32
    %c0_i32_1 = arith.constant 0 : i32
    return %c0_i32, %c0_i32_0 : i32, i32
  }
  func.func @transform_8(%arg0: i32) -> (i32, i32) {
    %c0_i32 = arith.constant 0 : i32
    %c0_i32_0 = arith.constant 0 : i32
    %c0_i32_1 = arith.constant 0 : i32
    return %c0_i32, %c0_i32_0 : i32, i32
  }
  func.func @transform_9(%arg0: i32) -> (i32, i32) {
    %c0_i32 = arith.constant 0 : i32
    %c0_i32_0 = arith.constant 0 : i32
    %c0_i32_1 = arith.constant 0 : i32
    return %c0_i32, %c0_i32_0 : i32, i32
  }
  func.func @transform_10(%arg0: i32) -> (i32, i32) {
    %c0_i32 = arith.constant 0 : i32
    %c0_i32_0 = arith.constant 0 : i32
    %c0_i32_1 = arith.constant 0 : i32
    return %c0_i32, %c0_i32_0 : i32, i32
  }
  func.func @transform_11(%arg0: i32) -> (i32, i32) {
    %c0_i32 = arith.constant 0 : i32
    %c0_i32_0 = arith.constant 0 : i32
    %c0_i32_1 = arith.constant 0 : i32
    return %c0_i32, %c0_i32_0 : i32, i32
  }
  func.func @transform_12(%arg0: i32) -> (i32, i32) {
    %c0_i32 = arith.constant 0 : i32
    %c0_i32_0 = arith.constant 0 : i32
    %c0_i32_1 = arith.constant 0 : i32
    return %c0_i32, %c0_i32_0 : i32, i32
  }
  func.func @transform_13(%arg0: i32) -> (i32, i32) {
    %c0_i32 = arith.constant 0 : i32
    %c0_i32_0 = arith.constant 0 : i32
    return %arg0, %c0_i32 : i32, i32
  }
}

</mosaic_0001>

<bundles_post_ra>
// kernel: mlp_forward.1
= control target key start
LH: loop header
LB: loop body
LE: loop exit
PB: predicated region body
PF: predicated region fallthrough
CT: control target
= control target key end

     0   :  { %v1114_v3 = vmov 0.0|0.0   ;;  %vm1115_vm0 = vmmov 0   ;;  %v1116_v6 = vmov 0.0   ;;  %s1569_s0 = inlined_call_operand.vmem [shape: f32[8,128], index: 0, kind: input, shape index: {}]   ;;  %s1570_s1 = inlined_call_operand.vmem [shape: f32[128,128], index: 1, kind: input, shape index: {}]   ;;  %s1571_s2 = inlined_call_operand.vmem [shape: f32[1,128], index: 2, kind: input, shape index: {}]   ;;  %s1572_s3 = inlined_call_operand.vmem [shape: f32[128,128], index: 3, kind: input, shape index: {}]   ;;  %s1573_s4 = inlined_call_operand.vmem [shape: f32[1,128], index: 4, kind: input, shape index: {}]   ;;  %s1574_s5 = inlined_call_operand.vmem [shape: f32[128,128], index: 5, kind: input, shape index: {}]   ;;  %s1575_s6 = inlined_call_operand.vmem [shape: f32[1,128], index: 6, kind: input, shape index: {}]   ;;  %s1576_s7 = inlined_call_operand.vmem [shape: f32[128,128], index: 7, kind: input, shape index: {}]   ;;  %s1577_s8 = inlined_call_operand.vmem [shape: f32[1,128], index: 8, kind: input, shape index: {}]   ;;  %s1578_s9 = inlined_call_operand.vmem [shape: f32[128,128], index: 9, kind: input, shape index: {}]   ;;  %s1579_s10 = inlined_call_operand.vmem [shape: f32[1,128], index: 10, kind: input, shape index: {}]   ;;  %s1580_s11 = inlined_call_operand.vmem [shape: f32[128,128], index: 11, kind: input, shape index: {}]   ;;  %s1581_s12 = inlined_call_operand.vmem [shape: f32[1,128], index: 12, kind: input, shape index: {}]   ;;  %s1582_s13 = inlined_call_operand.hbm [shape: f32[8,128], index: 13, kind: output, shape index: {}]  }
   0x1   :  { %v47_v0 = vld [vmem:[%s1570_s1] sm:$0xff]  ;;  %v48_v1 = vld [vmem:[%s1570_s1 + $0x8] sm:$0xff]  ;;  %v49_v2 = vld [vmem:[%s1570_s1 + $0x10] sm:$0xff]  ;;  %942 = vmatprep.subr.bf16.mxu0 %v1114_v3  ;;  %764 = vmatprep.mubr.msk.f32.mxu0 %vm1115_vm0, %v1116_v6 }
   0x2   :  { %v943_v4 = vpack.c.bf16 %v48_v1, %v47_v0  ;;  %v50_v5 = vld [vmem:[%s1570_s1 + $0x18] sm:$0xff]  ;;  %966 = vmatprep.subr.bf16.mxu1 %v1114_v3  ;;  %799 = vmatprep.mubr.msk.f32.mxu1 %vm1115_vm0, %v1116_v6  ;;  %v51_v8 = vld [vmem:[%s1570_s1 + $0x20] sm:$0xff]  ;;  %v52_v9 = vld [vmem:[%s1570_s1 + $0x28] sm:$0xff] }
   0x3   :  { %v946_v7 = vpack.c.bf16 %v50_v5, %v49_v2  ;;  %v141_v10 = vld [vmem:[%s1572_s3] sm:$0xff]  ;;  %v142_v11 = vld [vmem:[%s1572_s3 + $0x8] sm:$0xff]  ;;  %v143_v12 = vld [vmem:[%s1572_s3 + $0x10] sm:$0xff]  ;;  %v949_v14 = vpack.c.bf16 %v52_v9, %v51_v8 }
   0x4   :  { %944 = vmatpush3.bf16.msra.mxu0 %v943_v4  ;;  %v144_v13 = vld [vmem:[%s1572_s3 + $0x18] sm:$0xff]  ;;  %v967_v15 = vpack.c.bf16 %v142_v11, %v141_v10  ;;  %v53_v16 = vld [vmem:[%s1570_s1 + $0x30] sm:$0xff]  ;;  %v145_v19 = vld [vmem:[%s1572_s3 + $0x20] sm:$0xff] }
   0x5   :  { %945 = vmatprep.subr.bf16.mxu0 %v1114_v3  ;;  %v54_v17 = vld [vmem:[%s1570_s1 + $0x38] sm:$0xff]  ;;  %v970_v18 = vpack.c.bf16 %v144_v13, %v143_v12  ;;  %v146_v20 = vld [vmem:[%s1572_s3 + $0x28] sm:$0xff] }
   0x6   :  { %968 = vmatpush3.bf16.msra.mxu1 %v967_v15 }
   0x7   :  { %969 = vmatprep.subr.bf16.mxu1 %v1114_v3 }
   0x8   :  { %947 = vmatpush3.bf16.msra.mxu0 %v946_v7 }
   0x9   :  { %948 = vmatprep.subr.bf16.mxu0 %v1114_v3 }
   0xa   :  { %18 = vsyncpa [#allocation3], 0  ;;  %v952_v21 = vpack.c.bf16 %v54_v17, %v53_v16  ;;  %v55_v22 = vld [vmem:[%s1570_s1 + $0x40] sm:$0xff]  ;;  %v56_v23 = vld [vmem:[%s1570_s1 + $0x48] sm:$0xff]  ;;  %971 = vmatpush3.bf16.msra.mxu1 %v970_v18  ;;  %v973_v24 = vpack.c.bf16 %v146_v20, %v145_v19 }
   0xb   :  { %972 = vmatprep.subr.bf16.mxu1 %v1114_v3  ;;  %v147_v25 = vld [vmem:[%s1572_s3 + $0x30] sm:$0xff]  ;;  %v148_v26 = vld [vmem:[%s1572_s3 + $0x38] sm:$0xff]  ;;  %v955_v27 = vpack.c.bf16 %v56_v23, %v55_v22  ;;  %v149_v31 = vld [vmem:[%s1572_s3 + $0x40] sm:$0xff] }
   0xc   :  { %950 = vmatpush3.bf16.msra.mxu0 %v949_v14  ;;  %v57_v28 = vld [vmem:[%s1570_s1 + $0x50] sm:$0xff]  ;;  %v58_v29 = vld [vmem:[%s1570_s1 + $0x58] sm:$0xff]  ;;  %v976_v30 = vpack.c.bf16 %v148_v26, %v147_v25  ;;  %v150_v32 = vld [vmem:[%s1572_s3 + $0x48] sm:$0xff] }
   0xd   :  { %951 = vmatprep.subr.bf16.mxu0 %v1114_v3  ;;  %v958_v33 = vpack.c.bf16 %v58_v29, %v57_v28  ;;  %v59_v34 = vld [vmem:[%s1570_s1 + $0x60] sm:$0xff]  ;;  %v60_v35 = vld [vmem:[%s1570_s1 + $0x68] sm:$0xff]  ;;  %v979_v36 = vpack.c.bf16 %v150_v32, %v149_v31  ;;  %v151_v37 = vld [vmem:[%s1572_s3 + $0x50] sm:$0xff] }
   0xe   :  { %974 = vmatpush3.bf16.msra.mxu1 %v973_v24  ;;  %v152_v38 = vld [vmem:[%s1572_s3 + $0x58] sm:$0xff]  ;;  %v961_v39 = vpack.c.bf16 %v60_v35, %v59_v34  ;;  %v61_v40 = vld [vmem:[%s1570_s1 + $0x70] sm:$0xff]  ;;  %v153_v43 = vld [vmem:[%s1572_s3 + $0x60] sm:$0xff] }
   0xf   :  { %975 = vmatprep.subr.bf16.mxu1 %v1114_v3  ;;  %v62_v41 = vld [vmem:[%s1570_s1 + $0x78] sm:$0xff]  ;;  %v982_v42 = vpack.c.bf16 %v152_v38, %v151_v37  ;;  %v154_v44 = vld [vmem:[%s1572_s3 + $0x68] sm:$0xff]  ;;  %v45_v47 = vld [vmem:[%s1569_s0] sm:$0xff]  ;;  %s1117_s0 = smov [#allocation2]  }
  0x10   :  { %953 = vmatpush3.bf16.msra.mxu0 %v952_v21  ;;  %v964_v45 = vpack.c.bf16 %v62_v41, %v61_v40  ;;  %v985_v46 = vpack.c.bf16 %v154_v44, %v153_v43  ;;  %v155_v48 = vld [vmem:[%s1572_s3 + $0x70] sm:$0xff]  ;;  %v156_v49 = vld [vmem:[%s1572_s3 + $0x78] sm:$0xff]  ;;  %v235_v51 = vld [vmem:[%s1574_s5] sm:$0xff] }
  0x11   :  { %954 = vmatprep.subr.bf16.mxu0 %v1114_v3  ;;  %v988_v50 = vpack.c.bf16 %v156_v49, %v155_v48  ;;  %v236_v52 = vld [vmem:[%s1574_s5 + $0x8] sm:$0xff]  ;;  %v237_v53 = vld [vmem:[%s1574_s5 + $0x10] sm:$0xff]  ;;  %v238_v55 = vld [vmem:[%s1574_s5 + $0x18] sm:$0xff] }
  0x12   :  { %977 = vmatpush3.bf16.msra.mxu1 %v976_v30  ;;  %v991_v54 = vpack.c.bf16 %v236_v52, %v235_v51  ;;  %v994_v56 = vpack.c.bf16 %v238_v55, %v237_v53  ;;  %v239_v57 = vld [vmem:[%s1574_s5 + $0x20] sm:$0xff]  ;;  %v240_v58 = vld [vmem:[%s1574_s5 + $0x28] sm:$0xff]  ;;  %v241_v60 = vld [vmem:[%s1574_s5 + $0x30] sm:$0xff] }
  0x13   :  { %978 = vmatprep.subr.bf16.mxu1 %v1114_v3  ;;  %v997_v59 = vpack.c.bf16 %v240_v58, %v239_v57  ;;  %v242_v61 = vld [vmem:[%s1574_s5 + $0x38] sm:$0xff]  ;;  %v243_v63 = vld [vmem:[%s1574_s5 + $0x40] sm:$0xff]  ;;  %v244_v0 = vld [vmem:[%s1574_s5 + $0x48] sm:$0xff] }
  0x14   :  { %956 = vmatpush3.bf16.msra.mxu0 %v955_v27  ;;  %v1000_v62 = vpack.c.bf16 %v242_v61, %v241_v60  ;;  %v1003_v1 = vpack.c.bf16 %v244_v0, %v243_v63  ;;  %v245_v2 = vld [vmem:[%s1574_s5 + $0x50] sm:$0xff]  ;;  %v246_v4 = vld [vmem:[%s1574_s5 + $0x58] sm:$0xff]  ;;  %v247_v7 = vld [vmem:[%s1574_s5 + $0x60] sm:$0xff] }
  0x15   :  { %957 = vmatprep.subr.bf16.mxu0 %v1114_v3  ;;  %v1006_v5 = vpack.c.bf16 %v246_v4, %v245_v2  ;;  %v248_v8 = vld [vmem:[%s1574_s5 + $0x68] sm:$0xff]  ;;  %v624_v10 = vld [vmem:[%s1571_s2] ss:$0 sm:$0xff]  ;;  %v249_v15 = vld [vmem:[%s1574_s5 + $0x70] sm:$0xff] }
  0x16   :  { %980 = vmatpush3.bf16.msra.mxu1 %v979_v36  ;;  %v1009_v9 = vpack.c.bf16 %v248_v8, %v247_v7  ;;  %v250_v16 = vld [vmem:[%s1574_s5 + $0x78] sm:$0xff]  ;;  %v329_v18 = vld [vmem:[%s1576_s7] sm:$0xff]  ;;  %v330_v19 = vld [vmem:[%s1576_s7 + $0x8] sm:$0xff]  ;;  %s616_s5 = sshll.u32 %s1117_s0, 4  ;;  %s617_s5 = int_to_ptr.vmem [resolvable:$true] %s616_s5 }
  0x17   :  { %981 = vmatprep.subr.bf16.mxu1 %v1114_v3  ;;  %v1012_v17 = vpack.c.bf16 %v250_v16, %v249_v15  ;;  %v331_v20 = vld [vmem:[%s1576_s7 + $0x10] sm:$0xff]  ;;  %v1015_v21 = vpack.c.bf16 %v330_v19, %v329_v18  ;;  %v332_v22 = vld [vmem:[%s1576_s7 + $0x18] sm:$0xff]  ;;  %v333_v24 = vld [vmem:[%s1576_s7 + $0x20] sm:$0xff]  ;;  %p1095_p1 = scmp.lt.s32.totalorder %s617_s5, %s617_s5 }
  0x18   :  { %959 = vmatpush3.bf16.msra.mxu0 %v958_v33  ;;  %v1018_v23 = vpack.c.bf16 %v332_v22, %v331_v20  ;;  %v334_v25 = vld [vmem:[%s1576_s7 + $0x28] sm:$0xff]  ;;  %v335_v27 = vld [vmem:[%s1576_s7 + $0x30] sm:$0xff]  ;;  %v336_v28 = vld [vmem:[%s1576_s7 + $0x38] sm:$0xff] }
  0x19   :  { %960 = vmatprep.subr.bf16.mxu0 %v1114_v3  ;;  %v1021_v26 = vpack.c.bf16 %v334_v25, %v333_v24  ;;  %v1024_v29 = vpack.c.bf16 %v336_v28, %v335_v27  ;;  %v337_v30 = vld [vmem:[%s1576_s7 + $0x40] sm:$0xff]  ;;  %v338_v31 = vld [vmem:[%s1576_s7 + $0x48] sm:$0xff]  ;;  %v339_v33 = vld [vmem:[%s1576_s7 + $0x50] sm:$0xff] }
  0x1a   :  { %983 = vmatpush3.bf16.msra.mxu1 %v982_v42  ;;  %v1027_v32 = vpack.c.bf16 %v338_v31, %v337_v30  ;;  %v340_v34 = vld [vmem:[%s1576_s7 + $0x58] sm:$0xff]  ;;  %v341_v36 = vld [vmem:[%s1576_s7 + $0x60] sm:$0xff]  ;;  %v342_v37 = vld [vmem:[%s1576_s7 + $0x68] sm:$0xff] }
  0x1b   :  { %984 = vmatprep.subr.bf16.mxu1 %v1114_v3  ;;  %v1030_v35 = vpack.c.bf16 %v340_v34, %v339_v33  ;;  %v1033_v38 = vpack.c.bf16 %v342_v37, %v341_v36  ;;  %v343_v44 = vld [vmem:[%s1576_s7 + $0x70] sm:$0xff]  ;;  %v424_v48 = vld [vmem:[%s1578_s9 + $0x8] sm:$0xff]  ;;  %v426_v51 = vld [vmem:[%s1578_s9 + $0x18] sm:$0xff] }
  0x1c   :  { %962 = vmatpush3.bf16.msra.mxu0 %v961_v39  ;;  %v625_v39 = vld [vmem:[%s1573_s4] ss:$0 sm:$0xff]  ;;  %v425_v49 = vld [vmem:[%s1578_s9 + $0x10] sm:$0xff]  ;;  %v430_v57 = vld [vmem:[%s1578_s9 + $0x38] sm:$0xff] }
  0x1d   :  { %963 = vmatprep.subr.bf16.mxu0 %v1114_v3  ;;  %v1042_v52 = vpack.c.bf16 %v426_v51, %v425_v49  ;;  %v427_v53 = vld [vmem:[%s1578_s9 + $0x20] sm:$0xff]  ;;  %v432_v60 = vld [vmem:[%s1578_s9 + $0x48] sm:$0xff]  ;;  %v434_v63 = vld [vmem:[%s1578_s9 + $0x58] sm:$0xff] }
  0x1e   :  { %986 = vmatpush3.bf16.msra.mxu1 %v985_v46  ;;  %v436_v2 = vld [vmem:[%s1578_s9 + $0x68] sm:$0xff]  ;;  %v521_v19 = vld [vmem:[%s1580_s11 + $0x20] sm:$0xff]  ;;  %v523_v22 = vld [vmem:[%s1580_s11 + $0x30] sm:$0xff] }
  0x1f   :  { %987 = vmatprep.subr.bf16.mxu1 %v1114_v3  ;;  %v518_v15 = vld [vmem:[%s1580_s11 + $0x8] sm:$0xff]  ;;  %v525_v25 = vld [vmem:[%s1580_s11 + $0x40] sm:$0xff]  ;;  %v527_v28 = vld [vmem:[%s1580_s11 + $0x50] sm:$0xff] }
  0x20   :  { %965 = vmatpush3.bf16.msra.mxu0 %v964_v45  ;;  %v344_v45 = vld [vmem:[%s1576_s7 + $0x78] sm:$0xff]  ;;  %v522_v20 = vld [vmem:[%s1580_s11 + $0x28] sm:$0xff]  ;;  %v529_v31 = vld [vmem:[%s1580_s11 + $0x60] sm:$0xff] }
  0x21   :  { %990 = vmatprep.subr.bf16.mxu0 %v1114_v3  ;;  %v1036_v46 = vpack.c.bf16 %v344_v45, %v343_v44  ;;  %v627_v34 = vld [vmem:[%s1577_s8] ss:$0 sm:$0xff] }
  0x22   :  { %989 = vmatpush3.bf16.msra.mxu1 %v988_v50 }
  0x23   :  { %765 = vmatmul.mubr.f32.vlgmr.msra.gmra.mrb[0].mxu0 %v45_v47  ;;  %1014 = vmatprep.subr.bf16.mxu1 %v1114_v3  ;;  %v423_v47 = vld [vmem:[%s1578_s9] sm:$0xff] }
  0x24   :  { %834 = vmatprep.mubr.msk.f32.mxu0 %vm1115_vm0, %v1116_v6  ;;  %992 = vmatpush3.bf16.msra.mxu0 %v991_v54  ;;  %v1039_v50 = vpack.c.bf16 %v424_v48, %v423_v47  ;;  %v428_v54 = vld [vmem:[%s1578_s9 + $0x28] sm:$0xff] }
  0x25   :  { %993 = vmatprep.subr.bf16.mxu0 %v1114_v3  ;;  %v1045_v55 = vpack.c.bf16 %v428_v54, %v427_v53 }
  0x28   :  { %995 = vmatpush3.bf16.msra.mxu0 %v994_v56  ;;  %v429_v56 = vld [vmem:[%s1578_s9 + $0x30] sm:$0xff] }
  0x29   :  { %996 = vmatprep.subr.bf16.mxu0 %v1114_v3  ;;  %v1048_v58 = vpack.c.bf16 %v430_v57, %v429_v56 }
  0x2c   :  { %998 = vmatpush3.bf16.msra.mxu0 %v997_v59  ;;  %v431_v59 = vld [vmem:[%s1578_s9 + $0x40] sm:$0xff] }
  0x2d   :  { %999 = vmatprep.subr.bf16.mxu0 %v1114_v3  ;;  %v1051_v61 = vpack.c.bf16 %v432_v60, %v431_v59 }
  0x30   :  { %1001 = vmatpush3.bf16.msra.mxu0 %v1000_v62  ;;  %v433_v62 = vld [vmem:[%s1578_s9 + $0x50] sm:$0xff] }
  0x31   :  { %1002 = vmatprep.subr.bf16.mxu0 %v1114_v3  ;;  %v1054_v0 = vpack.c.bf16 %v434_v63, %v433_v62 }
  0x34   :  { %1004 = vmatpush3.bf16.msra.mxu0 %v1003_v1  ;;  %v435_v1 = vld [vmem:[%s1578_s9 + $0x60] sm:$0xff] }
  0x35   :  { %1005 = vmatprep.subr.bf16.mxu0 %v1114_v3  ;;  %v1057_v4 = vpack.c.bf16 %v436_v2, %v435_v1 }
  0x38   :  { %1007 = vmatpush3.bf16.msra.mxu0 %v1006_v5  ;;  %v626_v5 = vld [vmem:[%s1575_s6] ss:$0 sm:$0xff] }
  0x39   :  { %1008 = vmatprep.subr.bf16.mxu0 %v1114_v3 }
  0x3c   :  { %1010 = vmatpush3.bf16.msra.mxu0 %v1009_v9 }
  0x3d   :  { %1011 = vmatprep.subr.bf16.mxu0 %v1114_v3 }
  0x40   :  { %1013 = vmatpush3.bf16.msra.mxu0 %v1012_v17  ;;  %v520_v17 = vld [vmem:[%s1580_s11 + $0x18] sm:$0xff] }
  0x41   :  { %1038 = vmatprep.subr.bf16.mxu0 %v1114_v3 }
  0xf6   :  { %v135_v11 = vpop.f32.mrb[0].mxu0 }
  0xf7   :  { %v136_v12 = vadd.f32 %v624_v10, %v135_v11  ;;  %v766_v13 = vpop.f32.mrb[1].mxu0  ;;  %v437_v11 = vld [vmem:[%s1578_s9 + $0x70] sm:$0xff] }
  0xf9   :  { %v139_v14 = vmax.f32 %v136_v12, 0.0  ;;  %v438_v12 = vld [vmem:[%s1578_s9 + $0x78] sm:$0xff] }
  0xfa   :  { %v1060_v13 = vpack.c.bf16 %v438_v12, %v437_v11 }
  0xfb   :  { %800 = vmatmul.mubr.f32.vlgmr.msra.gmra.mrb[0].mxu1 %v139_v14  ;;  %v517_v14 = vld [vmem:[%s1580_s11] sm:$0xff] }
  0xfc   :  { %869 = vmatprep.mubr.msk.f32.mxu1 %vm1115_vm0, %v1116_v6  ;;  %1016 = vmatpush3.bf16.msra.mxu1 %v1015_v21  ;;  %v1063_v16 = vpack.c.bf16 %v518_v15, %v517_v14  ;;  %v1069_v21 = vpack.c.bf16 %v522_v20, %v521_v19 }
  0xfd   :  { %1017 = vmatprep.subr.bf16.mxu1 %v1114_v3 }
 0x100   :  { %1019 = vmatpush3.bf16.msra.mxu1 %v1018_v23  ;;  %v524_v23 = vld [vmem:[%s1580_s11 + $0x38] sm:$0xff] }
 0x101   :  { %1020 = vmatprep.subr.bf16.mxu1 %v1114_v3  ;;  %v1072_v24 = vpack.c.bf16 %v524_v23, %v523_v22 }
 0x104   :  { %1022 = vmatpush3.bf16.msra.mxu1 %v1021_v26  ;;  %v526_v26 = vld [vmem:[%s1580_s11 + $0x48] sm:$0xff] }
 0x105   :  { %1023 = vmatprep.subr.bf16.mxu1 %v1114_v3  ;;  %v1075_v27 = vpack.c.bf16 %v526_v26, %v525_v25 }
 0x108   :  { %1025 = vmatpush3.bf16.msra.mxu1 %v1024_v29  ;;  %v528_v29 = vld [vmem:[%s1580_s11 + $0x58] sm:$0xff] }
 0x109   :  { %1026 = vmatprep.subr.bf16.mxu1 %v1114_v3  ;;  %v1078_v30 = vpack.c.bf16 %v528_v29, %v527_v28 }
 0x10c   :  { %1028 = vmatpush3.bf16.msra.mxu1 %v1027_v32  ;;  %v530_v32 = vld [vmem:[%s1580_s11 + $0x68] sm:$0xff] }
 0x10d   :  { %1029 = vmatprep.subr.bf16.mxu1 %v1114_v3  ;;  %v1081_v33 = vpack.c.bf16 %v530_v32, %v529_v31 }
 0x110   :  { %1031 = vmatpush3.bf16.msra.mxu1 %v1030_v35 }
 0x111   :  { %1032 = vmatprep.subr.bf16.mxu1 %v1114_v3 }
 0x114   :  { %1034 = vmatpush3.bf16.msra.mxu1 %v1033_v38 }
 0x115   :  { %1035 = vmatprep.subr.bf16.mxu1 %v1114_v3 }
 0x118   :  { %1037 = vmatpush3.bf16.msra.mxu1 %v1036_v46  ;;  %v629_v46 = vld [vmem:[%s1581_s12] ss:$0 sm:$0xff] }
 0x119   :  { %1062 = vmatprep.subr.bf16.mxu1 %v1114_v3 }
 0x1ce   :  { %v229_v40 = vpop.f32.mrb[0].mxu1 }
 0x1cf   :  { %v230_v41 = vadd.f32 %v625_v39, %v229_v40  ;;  %v801_v42 = vpop.f32.mrb[1].mxu1  ;;  %v531_v39 = vld [vmem:[%s1580_s11 + $0x70] sm:$0xff]  ;;  %v532_v40 = vld [vmem:[%s1580_s11 + $0x78] sm:$0xff] }
 0x1d1   :  { %v233_v43 = vmax.f32 %v230_v41, 0.0  ;;  %v1084_v41 = vpack.c.bf16 %v532_v40, %v531_v39 }
 0x1d3   :  { %835 = vmatmul.mubr.f32.vlgmr.msra.gmra.mrb[2].mxu0 %v233_v43 }
 0x1d4   :  { %904 = vmatprep.mubr.msk.f32.mxu0 %vm1115_vm0, %v1116_v6  ;;  %1040 = vmatpush3.bf16.msra.mxu0 %v1039_v50 }
 0x1d5   :  { %1041 = vmatprep.subr.bf16.mxu0 %v1114_v3 }
 0x1d8   :  { %1043 = vmatpush3.bf16.msra.mxu0 %v1042_v52 }
 0x1d9   :  { %1044 = vmatprep.subr.bf16.mxu0 %v1114_v3 }
 0x1dc   :  { %1046 = vmatpush3.bf16.msra.mxu0 %v1045_v55 }
 0x1dd   :  { %1047 = vmatprep.subr.bf16.mxu0 %v1114_v3 }
 0x1e0   :  { %1049 = vmatpush3.bf16.msra.mxu0 %v1048_v58 }
 0x1e1   :  { %1050 = vmatprep.subr.bf16.mxu0 %v1114_v3 }
 0x1e4   :  { %1052 = vmatpush3.bf16.msra.mxu0 %v1051_v61 }
 0x1e5   :  { %1053 = vmatprep.subr.bf16.mxu0 %v1114_v3 }
 0x1e8   :  { %1055 = vmatpush3.bf16.msra.mxu0 %v1054_v0 }
 0x1e9   :  { %1056 = vmatprep.subr.bf16.mxu0 %v1114_v3 }
 0x1ec   :  { %1058 = vmatpush3.bf16.msra.mxu0 %v1057_v4 }
 0x1ed   :  { %1059 = vmatprep.subr.bf16.mxu0 %v1114_v3 }
 0x1f0   :  { %1061 = vmatpush3.bf16.msra.mxu0 %v1060_v13 }
 0x2a6   :  { %v323_v7 = vpop.f32.mrb[2].mxu0 }
 0x2a7   :  { %v324_v8 = vadd.f32 %v626_v5, %v323_v7  ;;  %v836_v9 = vpop.f32.mrb[3].mxu0 }
 0x2a9   :  { %v327_v10 = vmax.f32 %v324_v8, 0.0 }
 0x2ab   :  { %870 = vmatmul.mubr.f32.vlgmr.msra.gmra.mrb[2].mxu1 %v327_v10 }
 0x2ac   :  { %939 = vmatprep.mubr.msk.f32.mxu1 %vm1115_vm0, %v1116_v6  ;;  %v519_v6 = vld [vmem:[%s1580_s11 + $0x10] sm:$0xff]  ;;  %1064 = vmatpush3.bf16.msra.mxu1 %v1063_v16  ;;  %s1090_s11 = scalar_lea.vmem %s617_s5, 128 }
 0x2ad   :  { %v1066_v18 = vpack.c.bf16 %v520_v17, %v519_v6  ;;  %1065 = vmatprep.subr.bf16.mxu1 %v1114_v3  ;;  %p1091_p0 = scmp.ne.s32.totalorder %s617_s5, %s1090_s11  ;;  %p1096_p2 = scmp.lt.s32.totalorder %s1090_s11, %s1090_s11 }
 0x2af   :  { %p1097_p3 = por %p1096_p2, %p1095_p1 }
 0x2b0   :  { %1067 = vmatpush3.bf16.msra.mxu1 %v1066_v18 }
 0x2b1   :  { %1068 = vmatprep.subr.bf16.mxu1 %v1114_v3  ;;  %p1098_p4 = pnand %p1097_p3, %p1091_p0 }
 0x2b4   :  { %1070 = vmatpush3.bf16.msra.mxu1 %v1069_v21 }
 0x2b5   :  { %1071 = vmatprep.subr.bf16.mxu1 %v1114_v3 }
 0x2b8   :  { %1073 = vmatpush3.bf16.msra.mxu1 %v1072_v24 }
 0x2b9   :  { %1074 = vmatprep.subr.bf16.mxu1 %v1114_v3 }
 0x2bc   :  { %1076 = vmatpush3.bf16.msra.mxu1 %v1075_v27 }
 0x2bd   :  { %1077 = vmatprep.subr.bf16.mxu1 %v1114_v3 }
 0x2c0   :  { %1079 = vmatpush3.bf16.msra.mxu1 %v1078_v30 }
 0x2c1   :  { %1080 = vmatprep.subr.bf16.mxu1 %v1114_v3 }
 0x2c4   :  { %1082 = vmatpush3.bf16.msra.mxu1 %v1081_v33 }
 0x2c5   :  { %1083 = vmatprep.subr.bf16.mxu1 %v1114_v3  ;;  %v628_v3 = vld [vmem:[%s1579_s10] ss:$0 sm:$0xff] }
 0x2c8   :  { %1085 = vmatpush3.bf16.msra.mxu1 %v1084_v41 }
 0x37e   :  { %v417_v35 = vpop.f32.mrb[2].mxu1 }
 0x37f   :  { %v418_v36 = vadd.f32 %v627_v34, %v417_v35  ;;  %v871_v37 = vpop.f32.mrb[3].mxu1 }
 0x381   :  { %v421_v38 = vmax.f32 %v418_v36, 0.0 }
 0x383   :  { %905 = vmatmul.mubr.f32.vlgmr.msra.gmra.mrb[4].mxu0 %v421_v38 }
 0x456   :  { %v511_v42 = vpop.f32.mrb[4].mxu0 }
 0x457   :  { %v512_v43 = vadd.f32 %v628_v3, %v511_v42  ;;  %v906_v44 = vpop.f32.mrb[5].mxu0 }
 0x459   :  { %v515_v45 = vmax.f32 %v512_v43, 0.0 }
 0x45b   :  { %940 = vmatmul.mubr.f32.vlgmr.msra.gmra.mrb[4].mxu1 %v515_v45 }
 0x52e   :  { %v605_v47 = vpop.f32.mrb[4].mxu1 }
 0x52f   :  { %v606_v48 = vadd.f32 %v629_v46, %v605_v47  ;;  %v941_v49 = vpop.f32.mrb[5].mxu1 }
 0x531   :  { %609 = vst [vmem:[#allocation2] sm:$0xff] %v606_v48 }
 0x532   :  { %1101 = shalt.err (!%p1098_p4)
}
 0x533   :  { %s1102_s23 = scalar_lea.hbm %s1582_s13, 128 }
 0x534   :  { %p1103_p5 = scmp.ne.s32.totalorder %s1582_s13, %s1102_s23  ;;  %p1106_p6 = scmp.lt.u32.totalorder %s1102_s23, %s1582_s13 }
 0x536   :  { %p1108_p7 = pnand %p1106_p6, %p1103_p5 }
 0x538   :  { %1111 = shalt.err (!%p1108_p7)
}
 0x539   :  { %619 = dma.vmem_to_hbm [thread:$0]  %s617_s5, 128, %s1582_s13, [#allocation3]  }
 0x53a   :  { %1112 = dma.done.wait [#allocation3], 128  }
 0x53b   :  { %1113 = vsyncadd [#allocation3], 4294967168 }
 0x53c   :  { %623 = vsyncpa [#allocation3], 1 }

</bundles_post_ra>
